<compile_context>
chip_gen: v7x
topology: tpu7x:2x2x1
jax: 0.10.0
libtpu: 0.0.40
codegen_flags: <defaults>
</compile_context>

<pallas_src>
import jax
import jax.numpy as jnp
from jax.experimental import pallas as pl
from jax.experimental.pallas import tpu as pltpu

BN_EPS = 1e-5
LANE = 128
SUBLANE = 8
MXU_ALIGN = 256          # v6e/v7x MXU is 2x256x256 weight-stationary
MAX_BATCH_TILE = 256     # safe within v7x's 64 MiB VMEM; streams well on v5e/v6e


def _round_up(x, m):
    return (x + m - 1) // m * m


def _pad_axis(a, target, axis):
    pad = target - a.shape[axis]
    if pad == 0:
        return a
    widths = [(0, 0)] * a.ndim
    widths[axis] = (0, pad)
    return jnp.pad(a, widths)


def _pick_batch_tile(n, max_tile=MAX_BATCH_TILE):
    """Pick a batch tile that minimizes padded rows for ragged N (multiple of 8)."""
    nt = -(-n // max_tile)                    # number of batch tiles
    tn = _round_up(-(-n // nt), SUBLANE)      # rows per tile, sublane-aligned
    return tn, nt * tn


def _vmem_limit_bytes():
    """~75% of physical VMEM (96 MiB on v5e/v6e, 48 MiB on v7x); default scoped
    limits (16/32 MiB) throttle tile sizes."""
    cap = 64 << 20
    try:
        cap = int(pltpu.get_tpu_info().vmem_capacity_bytes)
    except Exception:
        pass
    return int(min(cap * 3 // 4, 100 << 20))


def _invariant_spec(block_shape, index_map):
    """Single-buffer a grid-invariant operand; fall back to the default if the
    installed Pallas version does not accept pipeline_mode."""
    try:
        return pl.BlockSpec(block_shape, index_map, pipeline_mode=pl.Buffered(1))
    except TypeError:
        return pl.BlockSpec(block_shape, index_map)


# ---- pass 1: h = x @ W1 (bf16 MXU, f32 acc) + per-column sum / sum-of-squares ----
# grid = (hidden tiles [parallel], batch tiles [arbitrary/reduction])
def linear_stats_kernel(x_ref, w1_ref, h_ref, sum_ref, sumsq_ref):
    @pl.when(pl.program_id(1) == 0)
    def _init():
        sum_ref[...] = jnp.zeros_like(sum_ref)
        sumsq_ref[...] = jnp.zeros_like(sumsq_ref)

    h = jnp.dot(x_ref[...], w1_ref[...], preferred_element_type=jnp.float32)
    h_ref[...] = h.astype(h_ref.dtype)                      # bf16 writeback
    sum_ref[...] += jnp.sum(h, axis=0, keepdims=True)       # stats from f32 h
    sumsq_ref[...] += jnp.sum(h * h, axis=0, keepdims=True)


# ---- pass 2: folded BN affine + ReLU + second Linear ----
def bn_relu_linear_kernel(h_ref, scale_ref, shift_ref, w2_ref, b2_ref, o_ref):
    hn = h_ref[...].astype(jnp.float32) * scale_ref[...] + shift_ref[...]
    hn = jnp.maximum(hn, 0.0)                                # ReLU
    out = jnp.dot(hn.astype(jnp.bfloat16), w2_ref[...],
                  preferred_element_type=jnp.float32) + b2_ref[...]
    o_ref[...] = out.astype(o_ref.dtype)


def prepare_params(w1, b1, gamma, beta, w2, b2):
    """One-time parameter preparation (padding + bf16 casts), hoisted out of the
    forward so the full weights are not re-read/re-written from HBM every step.

    b1 is accepted for interface parity with the PyTorch module but unused:
    train-mode BN subtracts the batch mean, so the first Linear's bias cancels
    exactly.
    """
    del b1
    in_dim, hidden = w1.shape
    out_dim = w2.shape[1]
    in_dim_p = _round_up(in_dim, MXU_ALIGN)
    hid_p = _round_up(hidden, MXU_ALIGN)
    out_dim_p = _round_up(out_dim, MXU_ALIGN)
    return {
        "w1": _pad_axis(_pad_axis(w1, in_dim_p, 0), hid_p, 1).astype(jnp.bfloat16),
        "w2": _pad_axis(_pad_axis(w2, hid_p, 0), out_dim_p, 1).astype(jnp.bfloat16),
        "gamma": _pad_axis(gamma, hid_p, 1).astype(jnp.float32),
        "beta": _pad_axis(beta, hid_p, 1).astype(jnp.float32),
        "b2": _pad_axis(b2, out_dim_p, 1).astype(jnp.float32),
        "in_dim": in_dim, "hidden": hidden, "out_dim": out_dim,
        "in_dim_p": in_dim_p, "hid_p": hid_p, "out_dim_p": out_dim_p,
    }


def mlp_forward(x, p):
    """BYOL MLP head forward (training-mode BatchNorm batch statistics)."""
    n, in_dim = x.shape
    assert in_dim == p["in_dim"]
    in_dim_p, hid_p, out_dim_p = p["in_dim_p"], p["hid_p"], p["out_dim_p"]

    tn, n_p = _pick_batch_tile(n)
    nt = n_p // tn
    hid_tile = 512 if hid_p % 512 == 0 else 256   # hid_p is a multiple of 256
    n_hid_tiles = hid_p // hid_tile
    vmem_limit = _vmem_limit_bytes()

    # Zero-padding is exact: padded x rows give zero h rows (no b1), which contribute
    # nothing to the sums; we divide by the true batch size n below. Padded hidden
    # columns get scale=shift=0 (gamma/beta padded with zeros) and w2 rows are zero.
    x_p = _pad_axis(_pad_axis(x, n_p, 0), in_dim_p, 1).astype(jnp.bfloat16)

    # ---- pass 1: matmul + BN statistics (hidden axis parallel, N axis reduction) ----
    h, col_sum, col_sumsq = pl.pallas_call(
        linear_stats_kernel,
        out_shape=(
            jax.ShapeDtypeStruct((n_p, hid_p), jnp.bfloat16),
            jax.ShapeDtypeStruct((1, hid_p), jnp.float32),
            jax.ShapeDtypeStruct((1, hid_p), jnp.float32),
        ),
        grid=(n_hid_tiles, nt),
        in_specs=[
            pl.BlockSpec((tn, in_dim_p), lambda j, i: (i, 0)),
            pl.BlockSpec((in_dim_p, hid_tile), lambda j, i: (0, j)),
        ],
        out_specs=(
            pl.BlockSpec((tn, hid_tile), lambda j, i: (i, j)),
            pl.BlockSpec((1, hid_tile), lambda j, i: (0, j)),
            pl.BlockSpec((1, hid_tile), lambda j, i: (0, j)),
        ),
        compiler_params=pltpu.CompilerParams(
            dimension_semantics=("parallel", "arbitrary"),
            vmem_limit_bytes=vmem_limit),
    )(x_p, p["w1"])

    # ---- tiny per-feature glue: fold train-mode BN into one scale/shift ----
    inv_n = jnp.float32(1.0 / n)                  # true batch size, not padded
    mean = col_sum * inv_n
    # E[h^2]-E[h]^2 in f32, clamped at 0; adequate for BN-normalized activations.
    var = jnp.maximum(col_sumsq * inv_n - mean * mean, 0.0)
    inv_std = jax.lax.rsqrt(var + BN_EPS)
    scale = p["gamma"] * inv_std
    shift = p["beta"] - mean * scale

    # ---- pass 2: normalize + ReLU + second Linear (batch axis fully parallel) ----
    y_p = pl.pallas_call(
        bn_relu_linear_kernel,
        out_shape=jax.ShapeDtypeStruct((n_p, out_dim_p), jnp.float32),
        grid=(nt,),
        in_specs=[
            pl.BlockSpec((tn, hid_p), lambda i: (i, 0)),
            _invariant_spec((1, hid_p), lambda i: (0, 0)),
            _invariant_spec((1, hid_p), lambda i: (0, 0)),
            _invariant_spec((hid_p, out_dim_p), lambda i: (0, 0)),
            _invariant_spec((1, out_dim_p), lambda i: (0, 0)),
        ],
        out_specs=pl.BlockSpec((tn, out_dim_p), lambda i: (i, 0)),
        compiler_params=pltpu.CompilerParams(
            dimension_semantics=("parallel",),
            vmem_limit_bytes=vmem_limit),
    )(h, scale, shift, p["w2"], p["b2"])

    return y_p[:n, :p["out_dim"]]


def make_params(key, in_dim, hidden_dim, out_dim):
    """Deterministic synthetic parameters (PyTorch Linear weight [out,in] stored
    transposed as [in,out] for the kernel)."""
    k1, k2, k3, k4 = jax.random.split(key, 4)
    bound1 = 1.0 / jnp.sqrt(in_dim)
    bound2 = 1.0 / jnp.sqrt(hidden_dim)
    w1 = jax.random.uniform(k1, (in_dim, hidden_dim), jnp.float32, -bound1, bound1)
    b1 = jax.random.uniform(k2, (1, hidden_dim), jnp.float32, -bound1, bound1)
    gamma = jnp.ones((1, hidden_dim), jnp.float32)    # BN weight init
    beta = jnp.zeros((1, hidden_dim), jnp.float32)    # BN bias init
    w2 = jax.random.uniform(k3, (hidden_dim, out_dim), jnp.float32, -bound2, bound2)
    b2 = jax.random.uniform(k4, (1, out_dim), jnp.float32, -bound2, bound2)
    return w1, b1, gamma, beta, w2, b2


def reference_forward(x, w1, b1, gamma, beta, w2, b2):
    """Pure-JAX f32 reference mirroring the PyTorch module (training-mode BN)."""
    h = x @ w1 + b1
    mean = jnp.mean(h, axis=0, keepdims=True)
    var = jnp.mean((h - mean) ** 2, axis=0, keepdims=True)
    h = (h - mean) / jnp.sqrt(var + BN_EPS) * gamma + beta
    h = jnp.maximum(h, 0.0)
    return h @ w2 + b2


if __name__ == "__main__":
    key = jax.random.PRNGKey(0)
    kx, kp = jax.random.split(key)

    # Small shapes consistent with MLP(in_dim, hidden_dim, out_dim); N and out_dim
    # intentionally not 128/256-aligned so the padding / ragged-batch paths run.
    N, IN_DIM, HIDDEN, OUT_DIM = 200, 128, 256, 192

    x = jax.random.normal(kx, (N, IN_DIM), jnp.float32)
    raw_params = make_params(kp, IN_DIM, HIDDEN, OUT_DIM)

    prepared = prepare_params(*raw_params)            # one-time weight prep (hoisted)
    out = jax.block_until_ready(mlp_forward(x, prepared))
    ref = reference_forward(x, *raw_params)

    assert out.shape == (N, OUT_DIM)
    # bf16 MXU operands + bf16 h intermediate (f32 accumulation / BN math) -> loosened tol.
    assert jnp.allclose(out, ref, atol=5e-2, rtol=5e-2), float(jnp.max(jnp.abs(out - ref)))

    print("KERNEL_OK")
</pallas_src>

<mosaic_0001>
module attributes {stable_mosaic.version = 11 : i64} {
  func.func @linear_stats_kernel(%arg0: i32, %arg1: i32, %arg2: memref<200x256xbf16, #tpu.memory_space<vmem>>, %arg3: memref<256x256xbf16, #tpu.memory_space<vmem>>, %arg4: memref<200x256xbf16, #tpu.memory_space<vmem>>, %arg5: memref<1x256xf32, #tpu.memory_space<vmem>>, %arg6: memref<1x256xf32, #tpu.memory_space<vmem>>) attributes {dimension_semantics = [#tpu.dimension_semantics<parallel>, #tpu.dimension_semantics<arbitrary>], iteration_bounds = array<i64: 1, 1>, scalar_prefetch = 0 : i64, scratch_operands = 0 : i64, tpu.core_type = #tpu.core_type<tc>, window_params = [{transform_indices = @transform_0, window_bounds = array<i64: 200, 256>}, {transform_indices = @transform_1, window_bounds = array<i64: 256, 256>}, {transform_indices = @transform_2, window_bounds = array<i64: 200, 256>}, {transform_indices = @transform_3, window_bounds = array<i64: 1, 256>}, {transform_indices = @transform_4, window_bounds = array<i64: 1, 256>}]} {
    %c0_i32 = arith.constant 0 : i32
    %0 = arith.cmpi eq, %arg1, %c0_i32 : i32
    %1 = arith.extui %0 : i1 to i32
    %c0_i32_0 = arith.constant 0 : i32
    %2 = arith.cmpi ne, %1, %c0_i32_0 : i32
    scf.if %2 {
      %cst_16 = arith.constant 0.000000e+00 : f32
      %19 = vector.broadcast %cst_16 : f32 to vector<1x256xf32>
      %c0_17 = arith.constant 0 : index
      %c0_18 = arith.constant 0 : index
      %20 = vector.load %arg5[%c0_17, %c0_18] : memref<1x256xf32, #tpu.memory_space<vmem>>, vector<1x256xf32>
      tpu.vector_store %arg5[%c0_17, %c0_18], %19 {strides = array<i32>} : memref<1x256xf32, #tpu.memory_space<vmem>>, vector<1x256xf32>,
      %cst_19 = arith.constant 0.000000e+00 : f32
      %21 = vector.broadcast %cst_19 : f32 to vector<1x256xf32>
      %c0_20 = arith.constant 0 : index
      %c0_21 = arith.constant 0 : index
      %22 = vector.load %arg6[%c0_20, %c0_21] : memref<1x256xf32, #tpu.memory_space<vmem>>, vector<1x256xf32>
      tpu.vector_store %arg6[%c0_20, %c0_21], %21 {strides = array<i32>} : memref<1x256xf32, #tpu.memory_space<vmem>>, vector<1x256xf32>,
    } else {
    }
    %c0 = arith.constant 0 : index
    %c0_1 = arith.constant 0 : index
    %3 = vector.load %arg2[%c0, %c0_1] : memref<200x256xbf16, #tpu.memory_space<vmem>>, vector<200x256xbf16>
    %c0_2 = arith.constant 0 : index
    %c0_3 = arith.constant 0 : index
    %4 = vector.load %arg3[%c0_2, %c0_3] : memref<256x256xbf16, #tpu.memory_space<vmem>>, vector<256x256xbf16>
    %cst = arith.constant dense<0.000000e+00> : vector<200x256xf32>
    %5 = tpu.matmul %3, %4, %cst {dimension_numbers = #tpu.dot_dimension_numbers<[1], [0], [0], [1], [0, 0, 1, 1], [], []>} : vector<200x256xbf16>, vector<256x256xbf16>, vector<200x256xf32> -> vector<200x256xf32>
    %6 = arith.truncf %5 : vector<200x256xf32> to vector<200x256xbf16>
    %c0_4 = arith.constant 0 : index
    %c0_5 = arith.constant 0 : index
    %7 = vector.load %arg4[%c0_4, %c0_5] : memref<200x256xbf16, #tpu.memory_space<vmem>>, vector<200x256xbf16>
    tpu.vector_store %arg4[%c0_4, %c0_5], %6 {strides = array<i32>} : memref<200x256xbf16, #tpu.memory_space<vmem>>, vector<200x256xbf16>,
    %c0_6 = arith.constant 0 : index
    %c0_7 = arith.constant 0 : index
    %8 = vector.load %arg5[%c0_6, %c0_7] : memref<1x256xf32, #tpu.memory_space<vmem>>, vector<1x256xf32>
    %cst_8 = arith.constant dense<0.000000e+00> : vector<256xf32>
    %9 = vector.multi_reduction <add>, %5, %cst_8 [0] : vector<200x256xf32> to vector<256xf32>
    %10 = vector.shape_cast %9 : vector<256xf32> to vector<1x256xf32>
    %11 = arith.addf %8, %10 : vector<1x256xf32>
    %c0_9 = arith.constant 0 : index
    %c0_10 = arith.constant 0 : index
    %12 = vector.load %arg5[%c0_9, %c0_10] : memref<1x256xf32, #tpu.memory_space<vmem>>, vector<1x256xf32>
    tpu.vector_store %arg5[%c0_9, %c0_10], %11 {strides = array<i32>} : memref<1x256xf32, #tpu.memory_space<vmem>>, vector<1x256xf32>,
    %c0_11 = arith.constant 0 : index
    %c0_12 = arith.constant 0 : index
    %13 = vector.load %arg6[%c0_11, %c0_12] : memref<1x256xf32, #tpu.memory_space<vmem>>, vector<1x256xf32>
    %14 = arith.mulf %5, %5 : vector<200x256xf32>
    %cst_13 = arith.constant dense<0.000000e+00> : vector<256xf32>
    %15 = vector.multi_reduction <add>, %14, %cst_13 [0] : vector<200x256xf32> to vector<256xf32>
    %16 = vector.shape_cast %15 : vector<256xf32> to vector<1x256xf32>
    %17 = arith.addf %13, %16 : vector<1x256xf32>
    %c0_14 = arith.constant 0 : index
    %c0_15 = arith.constant 0 : index
    %18 = vector.load %arg6[%c0_14, %c0_15] : memref<1x256xf32, #tpu.memory_space<vmem>>, vector<1x256xf32>
    tpu.vector_store %arg6[%c0_14, %c0_15], %17 {strides = array<i32>} : memref<1x256xf32, #tpu.memory_space<vmem>>, vector<1x256xf32>,
    return
  }
  func.func @transform_0(%arg0: i32, %arg1: i32) -> (i32, i32) {
    %c0_i32 = arith.constant 0 : i32
    %c0_i32_0 = arith.constant 0 : i32
    return %arg1, %c0_i32 : i32, i32
  }
  func.func @transform_1(%arg0: i32, %arg1: i32) -> (i32, i32) {
    %c0_i32 = arith.constant 0 : i32
    %c0_i32_0 = arith.constant 0 : i32
    return %c0_i32, %arg0 : i32, i32
  }
  func.func @transform_2(%arg0: i32, %arg1: i32) -> (i32, i32) {
    %c0_i32 = arith.constant 0 : i32
    return %arg1, %arg0 : i32, i32
  }
  func.func @transform_3(%arg0: i32, %arg1: i32) -> (i32, i32) {
    %c0_i32 = arith.constant 0 : i32
    %c0_i32_0 = arith.constant 0 : i32
    return %c0_i32, %arg0 : i32, i32
  }
  func.func @transform_4(%arg0: i32, %arg1: i32) -> (i32, i32) {
    %c0_i32 = arith.constant 0 : i32
    %c0_i32_0 = arith.constant 0 : i32
    return %c0_i32, %arg0 : i32, i32
  }
}

</mosaic_0001>

<bundles_post_ra>
// kernel: tpu_custom_call.1
= control target key start
LH: loop header
LB: loop body
LE: loop exit
PB: predicated region body
PF: predicated region fallthrough
CT: control target
= control target key end

     0   :  { %10 = vsyncpa [#allocation3], 0  ;;  %s1599_s0 = inlined_call_operand.hbm [shape: bf16[200,256], index: 0, kind: input, shape index: {}]   ;;  %s1600_s1 = inlined_call_operand.hbm [shape: bf16[256,256], index: 1, kind: input, shape index: {}]   ;;  %s1601_s2 = inlined_call_operand.hbm [shape: bf16[200,256], index: 2, kind: output, shape index: {0}]   ;;  %s1602_s3 = inlined_call_operand.hbm [shape: f32[1,256], index: 3, kind: output, shape index: {1}]   ;;  %s1603_s4 = inlined_call_operand.hbm [shape: f32[1,256], index: 4, kind: output, shape index: {2}]  }
   0x1   :  { %11 = vsyncpa [#allocation6], 0 }
   0x2   :  { %12 = vsyncpa [#allocation4], 0 }
   0x3   :  { %13 = vsyncpa [#allocation9], 0  ;;  %s1350_s15 = smov [#allocation2]   ;;  %s1232_s19 = scalar_lea.hbm %s1599_s0, 3200 }
   0x4   :  { %s19_s16 = sshll.u32 %s1350_s15, 4  ;;  %p1233_p0 = scmp.ne.s32.totalorder %s1599_s0, %s1232_s19  ;;  %s20_s16 = int_to_ptr.vmem [resolvable:$true] %s19_s16 }
   0x5   :  { %p1236_p1 = scmp.lt.u32.totalorder %s1232_s19, %s1599_s0 }
   0x7   :  { %p1238_p2 = pnand %p1236_p1, %p1233_p0 }
   0x9   :  { %1241 = shalt.err (!%p1238_p2)
}
   0xa   :  { %s1242_s24 = scalar_lea.vmem %s20_s16, 3200  ;;  %p1247_p4 = scmp.lt.s32.totalorder %s20_s16, %s20_s16 }
   0xb   :  { %p1243_p3 = scmp.ne.s32.totalorder %s20_s16, %s1242_s24  ;;  %p1248_p5 = scmp.lt.s32.totalorder %s1242_s24, %s1242_s24 }
   0xd   :  { %p1249_p6 = por %p1248_p5, %p1247_p4 }
   0xf   :  { %p1250_p7 = pnand %p1249_p6, %p1243_p3 }
  0x11   :  { %1253 = shalt.err (!%p1250_p7)
}
  0x12   :  { %s1351_s25 = smov 128   ;;  %s1352_s26 = smov 8  }
  0x13   :  { %25 = dma.hbm_to_vmem [thread:$0]  %s1599_s0, 3200, %s20_s16, [#allocation3], %s1351_s25, %s1351_s25, %s1352_s26  }
  0x14   :  { %s1353_s29 = smov [#allocation5]   ;;  %s1254_s7 = scalar_lea.hbm %s1600_s1, 4096 }
  0x15   :  { %s31_s30 = sshll.u32 %s1353_s29, 4  ;;  %p1255_p8 = scmp.ne.s32.totalorder %s1600_s1, %s1254_s7  ;;  %s32_s30 = int_to_ptr.vmem [resolvable:$true] %s31_s30 }
  0x16   :  { %p1258_p9 = scmp.lt.u32.totalorder %s1254_s7, %s1600_s1 }
  0x18   :  { %p1260_p10 = pnand %p1258_p9, %p1255_p8 }
  0x1a   :  { %1263 = shalt.err (!%p1260_p10)
}
  0x1b   :  { %s1264_s12 = scalar_lea.vmem %s32_s30, 4096  ;;  %p1269_p12 = scmp.lt.s32.totalorder %s32_s30, %s32_s30 }
  0x1c   :  { %p1265_p11 = scmp.ne.s32.totalorder %s32_s30, %s1264_s12  ;;  %p1270_p13 = scmp.lt.s32.totalorder %s1264_s12, %s1264_s12 }
  0x1e   :  { %p1271_p0 = por %p1270_p13, %p1269_p12 }
  0x20   :  { %p1272_p1 = pnand %p1271_p0, %p1265_p11 }
  0x22   :  { %1275 = shalt.err (!%p1272_p1)
}
  0x23   :  { %37 = dma.hbm_to_vmem [thread:$0]  %s1600_s1, 4096, %s32_s30, [#allocation6], %s1351_s25, %s1351_s25, %s1352_s26  }
  0x24   :  { %1342 = dma.done.wait [#allocation3], 3200  }
  0x25   :  { %1343 = vsyncadd [#allocation3], 4294964096 }
  0x26   :  { %1344 = dma.done.wait [#allocation6], 4096  }
  0x27   :  { %1345 = vsyncadd [#allocation6], 4294963200  ;;  %v1146_v0 = vld [vmem:[#allocation5 + $0x4] ss:$8 sps:$4 sm:$0xff]   ;;  %v1148_v1 = vld [vmem:[#allocation5] ss:$8 sps:$4 sm:$0xff]   ;;  %v48_v59 = vlaneseq }
  0x28   :  { %398 = vmatprep.subr.bf16.mxu0 %v1146_v0  ;;  %v1149_v2 = vld [vmem:[#allocation5 + $0x14] ss:$8 sps:$4 sm:$0xff]   ;;  %1105 = vmatprep.subr.bf16.mxu1 %v1146_v0  ;;  %v1151_v3 = vld [vmem:[#allocation5 + $0x10] ss:$8 sps:$4 sm:$0xff]   ;;  %v1152_v4 = vld [vmem:[#allocation5 + $0x24] ss:$8 sps:$4 sm:$0xff]  }
  0x29   :  { %399 = vmatpush1.bf16.msra.mxu0 %v1148_v1  ;;  %1121 = vmatpush1.bf16.msra.mxu1 %v1148_v1  ;;  %v1154_v5 = vld [vmem:[#allocation5 + $0x20] ss:$8 sps:$4 sm:$0xff]   ;;  %v1155_v6 = vld [vmem:[#allocation5 + $0x34] ss:$8 sps:$4 sm:$0xff]   ;;  %v1157_v7 = vld [vmem:[#allocation5 + $0x30] ss:$8 sps:$4 sm:$0xff]  }
  0x2a   :  { %400 = vmatprep.subr.bf16.mxu0 %v1149_v2  ;;  %1106 = vmatprep.subr.bf16.mxu1 %v1149_v2  ;;  %v1158_v8 = vld [vmem:[#allocation5 + $0x44] ss:$8 sps:$4 sm:$0xff]   ;;  %v1160_v9 = vld [vmem:[#allocation5 + $0x40] ss:$8 sps:$4 sm:$0xff]   ;;  %v1161_v10 = vld [vmem:[#allocation5 + $0x54] ss:$8 sps:$4 sm:$0xff]  }
  0x2b   :  { %v1163_v11 = vld [vmem:[#allocation5 + $0x50] ss:$8 sps:$4 sm:$0xff]   ;;  %v1164_v12 = vld [vmem:[#allocation5 + $0x64] ss:$8 sps:$4 sm:$0xff]   ;;  %v1166_v14 = vld [vmem:[#allocation5 + $0x60] ss:$8 sps:$4 sm:$0xff]  }
  0x2c   :  { %v1196_v13 = vld [vmem:[#allocation2 + $0x4] ss:$8 sps:$4 sm:$0xff]   ;;  %v1169_v16 = vld [vmem:[#allocation5 + $0x70] ss:$8 sps:$4 sm:$0xff]   ;;  %v1208_v17 = vld [vmem:[#allocation2 + $0x74] ss:$8 sps:$4 sm:$0xff]  }
  0x2d   :  { %401 = vmatpush1.bf16.msra.mxu0 %v1151_v3  ;;  %1122 = vmatpush1.bf16.msra.mxu1 %v1151_v3  ;;  %v1167_v15 = vld [vmem:[#allocation5 + $0x74] ss:$8 sps:$4 sm:$0xff]   ;;  %v1170_v18 = vld [vmem:[#allocation5 + $0x84] ss:$8 sps:$4 sm:$0xff]   ;;  %v1172_v19 = vld [vmem:[#allocation5 + $0x80] ss:$8 sps:$4 sm:$0xff]  }
  0x2e   :  { %402 = vmatprep.subr.bf16.mxu0 %v1152_v4  ;;  %1107 = vmatprep.subr.bf16.mxu1 %v1152_v4  ;;  %v1173_v20 = vld [vmem:[#allocation5 + $0x94] ss:$8 sps:$4 sm:$0xff]   ;;  %v1175_v21 = vld [vmem:[#allocation5 + $0x90] ss:$8 sps:$4 sm:$0xff]   ;;  %v1176_v22 = vld [vmem:[#allocation5 + $0xa4] ss:$8 sps:$4 sm:$0xff]  }
  0x2f   :  { %430 = vmatprep.mubr.bf16.mxu0 %v1196_v13  ;;  %500 = vmatprep.mubr.bf16.mxu1 %v1208_v17  ;;  %v1178_v23 = vld [vmem:[#allocation5 + $0xa0] ss:$8 sps:$4 sm:$0xff]   ;;  %v1179_v24 = vld [vmem:[#allocation5 + $0xb4] ss:$8 sps:$4 sm:$0xff]   ;;  %v1181_v25 = vld [vmem:[#allocation5 + $0xb0] ss:$8 sps:$4 sm:$0xff]  }
  0x30   :  { %v1182_v26 = vld [vmem:[#allocation5 + $0xc4] ss:$8 sps:$4 sm:$0xff]   ;;  %v1184_v27 = vld [vmem:[#allocation5 + $0xc0] ss:$8 sps:$4 sm:$0xff]   ;;  %v1185_v28 = vld [vmem:[#allocation5 + $0xd4] ss:$8 sps:$4 sm:$0xff]  }
  0x31   :  { %403 = vmatpush1.bf16.msra.mxu0 %v1154_v5  ;;  %1123 = vmatpush1.bf16.msra.mxu1 %v1154_v5  ;;  %v1187_v29 = vld [vmem:[#allocation5 + $0xd0] ss:$8 sps:$4 sm:$0xff]   ;;  %v1188_v30 = vld [vmem:[#allocation5 + $0xe4] ss:$8 sps:$4 sm:$0xff]   ;;  %v1190_v31 = vld [vmem:[#allocation5 + $0xe0] ss:$8 sps:$4 sm:$0xff]  }
  0x32   :  { %404 = vmatprep.subr.bf16.mxu0 %v1155_v6  ;;  %1108 = vmatprep.subr.bf16.mxu1 %v1155_v6  ;;  %v1191_v32 = vld [vmem:[#allocation5 + $0xf4] ss:$8 sps:$4 sm:$0xff]   ;;  %v1193_v33 = vld [vmem:[#allocation5 + $0xf0] ss:$8 sps:$4 sm:$0xff]   ;;  %vm1415_vm0 = vcmp.lt.s32.totalorder %v48_v59, 256  ;;  %v1354_v61 = vmov 0.0  }
  0x33   :  { %v1194_v34 = vld [vmem:[#allocation2] ss:$8 sps:$4 sm:$0xff]   ;;  %v1206_v35 = vld [vmem:[#allocation2 + $0x70] ss:$8 sps:$4 sm:$0xff]   ;;  %v1197_v36 = vld [vmem:[#allocation2 + $0x14] ss:$8 sps:$4 sm:$0xff]  }
  0x34   :  { %v1212_v37 = vld [vmem:[#allocation2 + $0x84] ss:$8 sps:$4 sm:$0xff]   ;;  %v1199_v38 = vld [vmem:[#allocation2 + $0x10] ss:$8 sps:$4 sm:$0xff]   ;;  %v1214_v39 = vld [vmem:[#allocation2 + $0x80] ss:$8 sps:$4 sm:$0xff]  }
  0x35   :  { %405 = vmatpush1.bf16.msra.mxu0 %v1157_v7  ;;  %1124 = vmatpush1.bf16.msra.mxu1 %v1157_v7  ;;  %v1200_v40 = vld [vmem:[#allocation2 + $0x24] ss:$8 sps:$4 sm:$0xff]   ;;  %v1218_v41 = vld [vmem:[#allocation2 + $0x94] ss:$8 sps:$4 sm:$0xff]   ;;  %v1202_v42 = vld [vmem:[#allocation2 + $0x20] ss:$8 sps:$4 sm:$0xff]  }
  0x36   :  { %406 = vmatprep.subr.bf16.mxu0 %v1158_v8  ;;  %1109 = vmatprep.subr.bf16.mxu1 %v1158_v8  ;;  %v1220_v43 = vld [vmem:[#allocation2 + $0x90] ss:$8 sps:$4 sm:$0xff]   ;;  %v1203_v44 = vld [vmem:[#allocation2 + $0x34] ss:$8 sps:$4 sm:$0xff]   ;;  %v1224_v45 = vld [vmem:[#allocation2 + $0xa4] ss:$8 sps:$4 sm:$0xff]  }
  0x37   :  { %v1205_v46 = vld [vmem:[#allocation2 + $0x30] ss:$8 sps:$4 sm:$0xff]   ;;  %v1226_v47 = vld [vmem:[#allocation2 + $0xa0] ss:$8 sps:$4 sm:$0xff]   ;;  %v1209_v48 = vld [vmem:[#allocation2 + $0x44] ss:$8 sps:$4 sm:$0xff]  }
  0x38   :  { %v1227_v49 = vld [vmem:[#allocation2 + $0xb4] ss:$8 sps:$4 sm:$0xff]   ;;  %v78_v50 = vld [vmem:[#allocation2 + $0xc0] sm:$0xff]  ;;  %v1229_v52 = vld [vmem:[#allocation2 + $0xb0] ss:$8 sps:$4 sm:$0xff]   ;;  %s1355_s1 = smov [#allocation7]  }
  0x39   :  { %407 = vmatpush1.bf16.msra.mxu0 %v1160_v9  ;;  %1125 = vmatpush1.bf16.msra.mxu1 %v1160_v9  ;;  %v1211_v51 = vld [vmem:[#allocation2 + $0x40] ss:$8 sps:$4 sm:$0xff]   ;;  %v1215_v53 = vld [vmem:[#allocation2 + $0x54] ss:$8 sps:$4 sm:$0xff]   ;;  %v1022_v54 = vcombine.high %v78_v50, %v78_v50  ;;  %v1217_v55 = vld [vmem:[#allocation2 + $0x50] ss:$8 sps:$4 sm:$0xff]   ;;  %v1021_v56 = vcombine.low %v78_v50, %v78_v50 }
  0x3a   :  { %408 = vmatprep.subr.bf16.mxu0 %v1161_v10  ;;  %1110 = vmatprep.subr.bf16.mxu1 %v1161_v10  ;;  %v1221_v57 = vld [vmem:[#allocation2 + $0x64] ss:$8 sps:$4 sm:$0xff]   ;;  %v1223_v58 = vld [vmem:[#allocation2 + $0x60] ss:$8 sps:$4 sm:$0xff]   ;;  %52 = vst.msk [vmem:[#allocation8] sm:$0x3] %vm1415_vm0, %v1354_v61 }
  0x3b   :  { %53 = vst.msk [vmem:[#allocation10] sm:$0x3] %vm1415_vm0, %v1354_v61  ;;  %s957_s14 = sshll.u32 %s1355_s1, 4  ;;  %s958_s14 = int_to_ptr.vmem [resolvable:$true] %s957_s14 }
  0x3c   :  { %s1276_s15 = scalar_lea.vmem %s958_s14, 3200  ;;  %p1281_p3 = scmp.lt.s32.totalorder %s958_s14, %s958_s14 }
  0x3d   :  { %409 = vmatpush1.bf16.msra.mxu0 %v1163_v11  ;;  %1126 = vmatpush1.bf16.msra.mxu1 %v1163_v11  ;;  %p1277_p2 = scmp.ne.s32.totalorder %s958_s14, %s1276_s15  ;;  %p1282_p4 = scmp.lt.s32.totalorder %s1276_s15, %s1276_s15 }
  0x3e   :  { %410 = vmatprep.subr.bf16.mxu0 %v1164_v12  ;;  %1111 = vmatprep.subr.bf16.mxu1 %v1164_v12 }
  0x3f   :  { %p1283_p5 = por %p1282_p4, %p1281_p3 }
  0x41   :  { %411 = vmatpush1.bf16.msra.mxu0 %v1166_v14  ;;  %1127 = vmatpush1.bf16.msra.mxu1 %v1166_v14  ;;  %p1284_p6 = pnand %p1283_p5, %p1277_p2 }
  0x42   :  { %412 = vmatprep.subr.bf16.mxu0 %v1167_v15  ;;  %1112 = vmatprep.subr.bf16.mxu1 %v1167_v15 }
  0x45   :  { %413 = vmatpush1.bf16.msra.mxu0 %v1169_v16  ;;  %1128 = vmatpush1.bf16.msra.mxu1 %v1169_v16 }
  0x46   :  { %414 = vmatprep.subr.bf16.mxu0 %v1170_v18  ;;  %1113 = vmatprep.subr.bf16.mxu1 %v1170_v18 }
  0x49   :  { %415 = vmatpush1.bf16.msra.mxu0 %v1172_v19  ;;  %1129 = vmatpush1.bf16.msra.mxu1 %v1172_v19 }
  0x4a   :  { %416 = vmatprep.subr.bf16.mxu0 %v1173_v20  ;;  %1114 = vmatprep.subr.bf16.mxu1 %v1173_v20 }
  0x4d   :  { %417 = vmatpush1.bf16.msra.mxu0 %v1175_v21  ;;  %1130 = vmatpush1.bf16.msra.mxu1 %v1175_v21 }
  0x4e   :  { %418 = vmatprep.subr.bf16.mxu0 %v1176_v22  ;;  %1115 = vmatprep.subr.bf16.mxu1 %v1176_v22 }
  0x51   :  { %419 = vmatpush1.bf16.msra.mxu0 %v1178_v23  ;;  %1131 = vmatpush1.bf16.msra.mxu1 %v1178_v23 }
  0x52   :  { %420 = vmatprep.subr.bf16.mxu0 %v1179_v24  ;;  %1116 = vmatprep.subr.bf16.mxu1 %v1179_v24 }
  0x55   :  { %421 = vmatpush1.bf16.msra.mxu0 %v1181_v25  ;;  %1132 = vmatpush1.bf16.msra.mxu1 %v1181_v25 }
  0x56   :  { %422 = vmatprep.subr.bf16.mxu0 %v1182_v26  ;;  %1117 = vmatprep.subr.bf16.mxu1 %v1182_v26 }
  0x59   :  { %423 = vmatpush1.bf16.msra.mxu0 %v1184_v27  ;;  %1133 = vmatpush1.bf16.msra.mxu1 %v1184_v27 }
  0x5a   :  { %424 = vmatprep.subr.bf16.mxu0 %v1185_v28  ;;  %1118 = vmatprep.subr.bf16.mxu1 %v1185_v28 }
  0x5d   :  { %425 = vmatpush1.bf16.msra.mxu0 %v1187_v29  ;;  %1134 = vmatpush1.bf16.msra.mxu1 %v1187_v29 }
  0x5e   :  { %426 = vmatprep.subr.bf16.mxu0 %v1188_v30  ;;  %1119 = vmatprep.subr.bf16.mxu1 %v1188_v30 }
  0x61   :  { %427 = vmatpush1.bf16.msra.mxu0 %v1190_v31  ;;  %1135 = vmatpush1.bf16.msra.mxu1 %v1190_v31 }
  0x62   :  { %428 = vmatprep.subr.bf16.mxu0 %v1191_v32  ;;  %1120 = vmatprep.subr.bf16.mxu1 %v1191_v32 }
  0x65   :  { %429 = vmatpush1.bf16.msra.mxu0 %v1193_v33  ;;  %1136 = vmatpush1.bf16.msra.mxu1 %v1193_v33 }
  0x68   :  { %431 = vmatmul.mubr.bf16.vlgmr.msra.gmra.mrb[0].mxu0 %v1194_v34  ;;  %501 = vmatmul.mubr.bf16.vlgmr.msra.gmra.mrb[0].mxu1 %v1206_v35 }
  0x69   :  { %440 = vmatprep.mubr.bf16.mxu0 %v1197_v36  ;;  %510 = vmatprep.mubr.bf16.mxu1 %v1212_v37 }
  0x70   :  { %441 = vmatmul.mubr.bf16.gmra.mrb[4].mxu0 %v1199_v38  ;;  %511 = vmatmul.mubr.bf16.gmra.mrb[4].mxu1 %v1214_v39 }
  0x71   :  { %450 = vmatprep.mubr.bf16.mxu0 %v1200_v40  ;;  %520 = vmatprep.mubr.bf16.mxu1 %v1218_v41 }
  0x78   :  { %451 = vmatmul.mubr.bf16.gmra.mrb[8].mxu0 %v1202_v42  ;;  %521 = vmatmul.mubr.bf16.gmra.mrb[8].mxu1 %v1220_v43 }
  0x79   :  { %460 = vmatprep.mubr.bf16.mxu0 %v1203_v44  ;;  %530 = vmatprep.mubr.bf16.mxu1 %v1224_v45 }
  0x80   :  { %461 = vmatmul.mubr.bf16.gmra.mrb[12].mxu0 %v1205_v46  ;;  %531 = vmatmul.mubr.bf16.gmra.mrb[12].mxu1 %v1226_v47 }
  0x81   :  { %470 = vmatprep.mubr.bf16.mxu0 %v1209_v48  ;;  %540 = vmatprep.mubr.bf16.mxu1 %v1227_v49 }
  0x88   :  { %471 = vmatmul.mubr.bf16.gmra.mrb[16].mxu0 %v1211_v51  ;;  %541 = vmatmul.mubr.bf16.gmra.mrb[16].mxu1 %v1229_v52 }
  0x89   :  { %480 = vmatprep.mubr.bf16.mxu0 %v1215_v53  ;;  %550 = vmatprep.mubr.bf16.mxu1 %v1022_v54 }
  0x90   :  { %481 = vmatmul.mubr.bf16.gmra.mrb[20].mxu0 %v1217_v55  ;;  %551 = vmatmul.mubr.bf16.gmra.mrb[20].mxu1 %v1021_v56 }
  0x91   :  { %490 = vmatprep.mubr.bf16.mxu0 %v1221_v57 }
  0x98   :  { %491 = vmatmul.mubr.bf16.gmra.mrb[24].mxu0 %v1223_v58 }
 0x13b   :  { %v432_v62 = vpop.f32.mrb[0].mxu0  ;;  %v1423_v63 = vpop.f32.mrb[0].mxu1 }
 0x13c   :  { %v434_v0 = vpop.f32.mrb[1].mxu0  ;;  %v1425_v1 = vpop.f32.mrb[1].mxu1  ;;  %v822_v6 = vmul.f32 %v432_v62, %v432_v62 }
 0x13d   :  { %v1080_v2 = vpack.c.bf16 %v434_v0, %v432_v62  ;;  %v436_v3 = vpop.f32.mrb[2].mxu0  ;;  %v1094_v4 = vpack.c.bf16 %v1425_v1, %v1423_v63  ;;  %v1429_v5 = vpop.f32.mrb[2].mxu1  ;;  %v823_v7 = vmul.f32 %v434_v0, %v434_v0 }
 0x13e   :  { %v737_v8 = vadd.f32 %v436_v3, %v432_v62  ;;  %v824_v9 = vmul.f32 %v436_v3, %v436_v3  ;;  %v438_v10 = vpop.f32.mrb[3].mxu0  ;;  %v1431_v11 = vpop.f32.mrb[3].mxu1 }
 0x13f   :  { %711 = vst [vmem:[#allocation7] sm:$0xff] %v1080_v2  ;;  %v1081_v12 = vpack.c.bf16 %v438_v10, %v436_v3  ;;  %v767_v13 = vadd.f32 %v438_v10, %v434_v0  ;;  %v825_v14 = vmul.f32 %v438_v10, %v438_v10  ;;  %725 = vst [vmem:[#allocation7 + $0x70] sm:$0xff] %v1094_v4 }
 0x140   :  { %v1095_v15 = vpack.c.bf16 %v1431_v11, %v1429_v5  ;;  %v872_v16 = vadd.f32 %v824_v9, %v822_v6 }
 0x141   :  { %712 = vst [vmem:[#allocation7 + $0x8] sm:$0xff] %v1081_v12  ;;  %v902_v17 = vadd.f32 %v825_v14, %v823_v7 }
 0x142   :  { %726 = vst [vmem:[#allocation7 + $0x78] sm:$0xff] %v1095_v15 }
 0x143   :  { %v442_v18 = vpop.f32.mrb[4].mxu0  ;;  %v1435_v19 = vpop.f32.mrb[4].mxu1 }
 0x144   :  { %v738_v20 = vadd.f32 %v737_v8, %v442_v18  ;;  %v826_v21 = vmul.f32 %v442_v18, %v442_v18  ;;  %v444_v22 = vpop.f32.mrb[5].mxu0  ;;  %v1437_v23 = vpop.f32.mrb[5].mxu1 }
 0x145   :  { %v1082_v24 = vpack.c.bf16 %v444_v22, %v442_v18  ;;  %v768_v25 = vadd.f32 %v767_v13, %v444_v22  ;;  %v827_v26 = vmul.f32 %v444_v22, %v444_v22  ;;  %v446_v27 = vpop.f32.mrb[6].mxu0  ;;  %v1096_v28 = vpack.c.bf16 %v1437_v23, %v1435_v19  ;;  %v1441_v29 = vpop.f32.mrb[6].mxu1 }
 0x146   :  { %v873_v30 = vadd.f32 %v872_v16, %v826_v21  ;;  %v739_v31 = vadd.f32 %v738_v20, %v446_v27  ;;  %v828_v32 = vmul.f32 %v446_v27, %v446_v27  ;;  %v448_v33 = vpop.f32.mrb[7].mxu0  ;;  %v1443_v34 = vpop.f32.mrb[7].mxu1 }
 0x147   :  { %713 = vst [vmem:[#allocation7 + $0x10] sm:$0xff] %v1082_v24  ;;  %v903_v35 = vadd.f32 %v902_v17, %v827_v26  ;;  %v1083_v36 = vpack.c.bf16 %v448_v33, %v446_v27  ;;  %v769_v37 = vadd.f32 %v768_v25, %v448_v33  ;;  %v829_v38 = vmul.f32 %v448_v33, %v448_v33 }
 0x148   :  { %727 = vst [vmem:[#allocation7 + $0x80] sm:$0xff] %v1096_v28  ;;  %v874_v39 = vadd.f32 %v873_v30, %v828_v32  ;;  %v1097_v40 = vpack.c.bf16 %v1443_v34, %v1441_v29 }
 0x149   :  { %714 = vst [vmem:[#allocation7 + $0x18] sm:$0xff] %v1083_v36  ;;  %v904_v41 = vadd.f32 %v903_v35, %v829_v38 }
 0x14a   :  { %728 = vst [vmem:[#allocation7 + $0x88] sm:$0xff] %v1097_v40 }
 0x14b   :  { %v452_v42 = vpop.f32.mrb[8].mxu0  ;;  %v1447_v43 = vpop.f32.mrb[8].mxu1 }
 0x14c   :  { %v740_v44 = vadd.f32 %v739_v31, %v452_v42  ;;  %v830_v45 = vmul.f32 %v452_v42, %v452_v42  ;;  %v454_v46 = vpop.f32.mrb[9].mxu0  ;;  %v1449_v47 = vpop.f32.mrb[9].mxu1 }
 0x14d   :  { %v1084_v48 = vpack.c.bf16 %v454_v46, %v452_v42  ;;  %v770_v49 = vadd.f32 %v769_v37, %v454_v46  ;;  %v831_v50 = vmul.f32 %v454_v46, %v454_v46  ;;  %v456_v51 = vpop.f32.mrb[10].mxu0  ;;  %v1098_v52 = vpack.c.bf16 %v1449_v47, %v1447_v43  ;;  %v1453_v53 = vpop.f32.mrb[10].mxu1 }
 0x14e   :  { %v875_v54 = vadd.f32 %v874_v39, %v830_v45  ;;  %v741_v55 = vadd.f32 %v740_v44, %v456_v51  ;;  %v832_v56 = vmul.f32 %v456_v51, %v456_v51  ;;  %v458_v57 = vpop.f32.mrb[11].mxu0  ;;  %v1455_v58 = vpop.f32.mrb[11].mxu1 }
 0x14f   :  { %715 = vst [vmem:[#allocation7 + $0x20] sm:$0xff] %v1084_v48  ;;  %v905_v61 = vadd.f32 %v904_v41, %v831_v50  ;;  %v1085_v62 = vpack.c.bf16 %v458_v57, %v456_v51  ;;  %v771_v0 = vadd.f32 %v770_v49, %v458_v57  ;;  %v833_v2 = vmul.f32 %v458_v57, %v458_v57 }
 0x150   :  { %729 = vst [vmem:[#allocation7 + $0x90] sm:$0xff] %v1098_v52  ;;  %v876_v3 = vadd.f32 %v875_v54, %v832_v56  ;;  %v1099_v4 = vpack.c.bf16 %v1455_v58, %v1453_v53 }
 0x151   :  { %716 = vst [vmem:[#allocation7 + $0x28] sm:$0xff] %v1085_v62  ;;  %v906_v6 = vadd.f32 %v905_v61, %v833_v2 }
 0x152   :  { %730 = vst [vmem:[#allocation7 + $0x98] sm:$0xff] %v1099_v4 }
 0x153   :  { %v462_v7 = vpop.f32.mrb[12].mxu0  ;;  %v1459_v8 = vpop.f32.mrb[12].mxu1 }
 0x154   :  { %v742_v9 = vadd.f32 %v741_v55, %v462_v7  ;;  %v834_v10 = vmul.f32 %v462_v7, %v462_v7  ;;  %v464_v12 = vpop.f32.mrb[13].mxu0  ;;  %v1461_v13 = vpop.f32.mrb[13].mxu1 }
 0x155   :  { %v1086_v14 = vpack.c.bf16 %v464_v12, %v462_v7  ;;  %v772_v15 = vadd.f32 %v771_v0, %v464_v12  ;;  %v835_v16 = vmul.f32 %v464_v12, %v464_v12  ;;  %v466_v17 = vpop.f32.mrb[14].mxu0  ;;  %v1100_v18 = vpack.c.bf16 %v1461_v13, %v1459_v8  ;;  %v1465_v20 = vpop.f32.mrb[14].mxu1 }
 0x156   :  { %v877_v21 = vadd.f32 %v876_v3, %v834_v10  ;;  %v743_v22 = vadd.f32 %v742_v9, %v466_v17  ;;  %v836_v24 = vmul.f32 %v466_v17, %v466_v17  ;;  %v468_v25 = vpop.f32.mrb[15].mxu0  ;;  %v1467_v26 = vpop.f32.mrb[15].mxu1 }
 0x157   :  { %717 = vst [vmem:[#allocation7 + $0x30] sm:$0xff] %v1086_v14  ;;  %v907_v27 = vadd.f32 %v906_v6, %v835_v16  ;;  %v1087_v28 = vpack.c.bf16 %v468_v25, %v466_v17  ;;  %v773_v30 = vadd.f32 %v772_v15, %v468_v25  ;;  %v837_v31 = vmul.f32 %v468_v25, %v468_v25 }
 0x158   :  { %731 = vst [vmem:[#allocation7 + $0xa0] sm:$0xff] %v1100_v18  ;;  %v878_v32 = vadd.f32 %v877_v21, %v836_v24  ;;  %v1101_v33 = vpack.c.bf16 %v1467_v26, %v1465_v20 }
 0x159   :  { %718 = vst [vmem:[#allocation7 + $0x38] sm:$0xff] %v1087_v28  ;;  %v908_v35 = vadd.f32 %v907_v27, %v837_v31 }
 0x15a   :  { %732 = vst [vmem:[#allocation7 + $0xa8] sm:$0xff] %v1101_v33 }
 0x15b   :  { %v472_v36 = vpop.f32.mrb[16].mxu0  ;;  %v1471_v37 = vpop.f32.mrb[16].mxu1 }
 0x15c   :  { %v744_v38 = vadd.f32 %v743_v22, %v472_v36  ;;  %v838_v39 = vmul.f32 %v472_v36, %v472_v36  ;;  %v474_v40 = vpop.f32.mrb[17].mxu0  ;;  %v1473_v41 = vpop.f32.mrb[17].mxu1 }
 0x15d   :  { %v1088_v42 = vpack.c.bf16 %v474_v40, %v472_v36  ;;  %v774_v44 = vadd.f32 %v773_v30, %v474_v40  ;;  %v839_v45 = vmul.f32 %v474_v40, %v474_v40  ;;  %v476_v46 = vpop.f32.mrb[18].mxu0  ;;  %v1102_v48 = vpack.c.bf16 %v1473_v41, %v1471_v37  ;;  %v1477_v49 = vpop.f32.mrb[18].mxu1 }
 0x15e   :  { %v879_v50 = vadd.f32 %v878_v32, %v838_v39  ;;  %v745_v51 = vadd.f32 %v744_v38, %v476_v46  ;;  %v840_v52 = vmul.f32 %v476_v46, %v476_v46  ;;  %v478_v54 = vpop.f32.mrb[19].mxu0  ;;  %v1479_v55 = vpop.f32.mrb[19].mxu1 }
 0x15f   :  { %719 = vst [vmem:[#allocation7 + $0x40] sm:$0xff] %v1088_v42  ;;  %v909_v56 = vadd.f32 %v908_v35, %v839_v45  ;;  %v1089_v57 = vpack.c.bf16 %v478_v54, %v476_v46  ;;  %v775_v61 = vadd.f32 %v774_v44, %v478_v54  ;;  %v841_v62 = vmul.f32 %v478_v54, %v478_v54 }
 0x160   :  { %733 = vst [vmem:[#allocation7 + $0xb0] sm:$0xff] %v1102_v48  ;;  %v880_v0 = vadd.f32 %v879_v50, %v840_v52  ;;  %v1103_v2 = vpack.c.bf16 %v1479_v55, %v1477_v49 }
 0x161   :  { %720 = vst [vmem:[#allocation7 + $0x48] sm:$0xff] %v1089_v57  ;;  %v910_v3 = vadd.f32 %v909_v56, %v841_v62 }
 0x162   :  { %734 = vst [vmem:[#allocation7 + $0xb8] sm:$0xff] %v1103_v2 }
 0x163   :  { %v482_v4 = vpop.f32.mrb[20].mxu0  ;;  %v1483_v6 = vpop.f32.mrb[20].mxu1 }
 0x164   :  { %v746_v7 = vadd.f32 %v745_v51, %v482_v4  ;;  %v842_v9 = vmul.f32 %v482_v4, %v482_v4  ;;  %v484_v10 = vpop.f32.mrb[21].mxu0  ;;  %v1485_v12 = vpop.f32.mrb[21].mxu1 }
 0x165   :  { %v1090_v14 = vpack.c.bf16 %v484_v10, %v482_v4  ;;  %v776_v15 = vadd.f32 %v775_v61, %v484_v10  ;;  %v843_v16 = vmul.f32 %v484_v10, %v484_v10  ;;  %v486_v17 = vpop.f32.mrb[22].mxu0  ;;  %v1104_v18 = vpack.c.bf16 %v1485_v12, %v1483_v6  ;;  %v556_v21 = vpop.f32.mrb[22].mxu1 }
 0x166   :  { %v881_v22 = vadd.f32 %v880_v0, %v842_v9  ;;  %v747_v24 = vadd.f32 %v746_v7, %v486_v17  ;;  %v844_v25 = vmul.f32 %v486_v17, %v486_v17  ;;  %v488_v27 = vpop.f32.mrb[23].mxu0  ;;  %v557_v28 = vpop.f32.mrb[23].mxu1  ;;  %v850_v0 = vmul.f32 %v1423_v63, %v1423_v63 }
 0x167   :  { %721 = vst [vmem:[#allocation7 + $0x50] sm:$0xff] %v1090_v14  ;;  %v911_v30 = vadd.f32 %v910_v3, %v843_v16  ;;  %v1091_v31 = vpack.c.bf16 %v488_v27, %v486_v17  ;;  %v777_v32 = vadd.f32 %v776_v15, %v488_v27  ;;  %v845_v33 = vmul.f32 %v488_v27, %v488_v27 }
 0x168   :  { %735 = vst [vmem:[#allocation7 + $0xc0] sm:$0xff] %v1104_v18  ;;  %v882_v35 = vadd.f32 %v881_v22, %v844_v25  ;;  %v851_v4 = vmul.f32 %v1425_v1, %v1425_v1  ;;  %v852_v10 = vmul.f32 %v1429_v5, %v1429_v5 }
 0x169   :  { %722 = vst [vmem:[#allocation7 + $0x58] sm:$0xff] %v1091_v31  ;;  %v912_v36 = vadd.f32 %v911_v30, %v845_v33 }
 0x16b   :  { %v492_v38 = vpop.f32.mrb[24].mxu0 }
 0x16c   :  { %v748_v39 = vadd.f32 %v747_v24, %v492_v38  ;;  %v846_v40 = vmul.f32 %v492_v38, %v492_v38  ;;  %v494_v42 = vpop.f32.mrb[25].mxu0 }
 0x16d   :  { %v1092_v44 = vpack.c.bf16 %v494_v42, %v492_v38  ;;  %v778_v45 = vadd.f32 %v777_v32, %v494_v42  ;;  %v847_v46 = vmul.f32 %v494_v42, %v494_v42  ;;  %v496_v48 = vpop.f32.mrb[26].mxu0 }
 0x16e   :  { %v883_v50 = vadd.f32 %v882_v35, %v846_v40  ;;  %v749_v51 = vadd.f32 %v748_v39, %v496_v48  ;;  %v848_v52 = vmul.f32 %v496_v48, %v496_v48  ;;  %v498_v54 = vpop.f32.mrb[27].mxu0 }
 0x16f   :  { %723 = vst [vmem:[#allocation7 + $0x60] sm:$0xff] %v1092_v44  ;;  %v913_v56 = vadd.f32 %v912_v36, %v847_v46  ;;  %v1093_v57 = vpack.c.bf16 %v498_v54, %v496_v48  ;;  %v779_v61 = vadd.f32 %v778_v45, %v498_v54  ;;  %v849_v62 = vmul.f32 %v498_v54, %v498_v54 }
 0x170   :  { %v750_v2 = vadd.f32 %v749_v51, %v1423_v63  ;;  %v884_v3 = vadd.f32 %v883_v50, %v848_v52 }
 0x171   :  { %724 = vst [vmem:[#allocation7 + $0x68] sm:$0xff] %v1093_v57  ;;  %v780_v7 = vadd.f32 %v779_v61, %v1425_v1  ;;  %v914_v9 = vadd.f32 %v913_v56, %v849_v62 }
 0x172   :  { %v751_v14 = vadd.f32 %v750_v2, %v1429_v5  ;;  %v885_v15 = vadd.f32 %v884_v3, %v850_v0 }
 0x173   :  { %1287 = shalt.err (!%p1284_p6)
}
 0x174   :  { %s1288_s18 = scalar_lea.hbm %s1601_s2, 3200 }
 0x175   :  { %p1289_p7 = scmp.ne.s32.totalorder %s1601_s2, %s1288_s18  ;;  %p1292_p8 = scmp.lt.u32.totalorder %s1288_s18, %s1601_s2 }
 0x177   :  { %p1294_p9 = pnand %p1292_p8, %p1289_p7 }
 0x179   :  { %1297 = shalt.err (!%p1294_p9)
}
 0x17a   :  { %963 = dma.vmem_to_hbm [thread:$0]  %s958_s14, 3200, %s1601_s2, [#allocation4], %s1351_s25, %s1351_s25, %s1352_s26   ;;  %v853_v63 = vmul.f32 %v1431_v11, %v1431_v11  ;;  %v781_v1 = vadd.f32 %v780_v7, %v1431_v11  ;;  %v915_v5 = vadd.f32 %v914_v9, %v851_v4  ;;  %v854_v16 = vmul.f32 %v1435_v19, %v1435_v19 }
 0x17b   :  { %v752_v17 = vadd.f32 %v751_v14, %v1435_v19  ;;  %v886_v18 = vadd.f32 %v885_v15, %v852_v10  ;;  %v855_v21 = vmul.f32 %v1437_v23, %v1437_v23  ;;  %v856_v25 = vmul.f32 %v1441_v29, %v1441_v29  ;;  %s1357_s2 = smov [#allocation8]   ;;  %s1358_s26 = smov [#allocation10]  }
 0x17c   :  { %v782_v22 = vadd.f32 %v781_v1, %v1437_v23  ;;  %v916_v24 = vadd.f32 %v915_v5, %v853_v63  ;;  %v857_v11 = vmul.f32 %v1443_v34, %v1443_v34  ;;  %v858_v19 = vmul.f32 %v1447_v43, %v1447_v43  ;;  %s970_s25 = sshll.u32 %s1357_s2, 4  ;;  %s980_s27 = sshll.u32 %s1358_s26, 4  ;;  %s971_s25 = int_to_ptr.vmem [resolvable:$true] %s970_s25  ;;  %s981_s27 = int_to_ptr.vmem [resolvable:$true] %s980_s27 }
 0x17d   :  { %v887_v27 = vadd.f32 %v886_v18, %v854_v16  ;;  %v753_v28 = vadd.f32 %v752_v17, %v1441_v29  ;;  %v859_v23 = vmul.f32 %v1449_v47, %v1449_v47  ;;  %v860_v29 = vmul.f32 %v1453_v53, %v1453_v53  ;;  %s1298_s28 = scalar_lea.vmem %s971_s25, 32  ;;  %p1303_p11 = scmp.lt.s32.totalorder %s971_s25, %s971_s25 }
 0x17e   :  { %v917_v30 = vadd.f32 %v916_v24, %v855_v21  ;;  %v783_v31 = vadd.f32 %v782_v22, %v1443_v34  ;;  %v861_v34 = vmul.f32 %v1455_v58, %v1455_v58  ;;  %v862_v44 = vmul.f32 %v1459_v8, %v1459_v8  ;;  %p1299_p10 = scmp.ne.s32.totalorder %s971_s25, %s1298_s28  ;;  %p1304_p12 = scmp.lt.s32.totalorder %s1298_s28, %s1298_s28 }
 0x17f   :  { %v754_v32 = vadd.f32 %v753_v28, %v1447_v43  ;;  %v888_v33 = vadd.f32 %v887_v27, %v856_v25  ;;  %v863_v46 = vmul.f32 %v1461_v13, %v1461_v13  ;;  %v864_v51 = vmul.f32 %v1465_v20, %v1465_v20 }
 0x180   :  { %v784_v35 = vadd.f32 %v783_v31, %v1449_v47  ;;  %v918_v36 = vadd.f32 %v917_v30, %v857_v11  ;;  %v865_v54 = vmul.f32 %v1467_v26, %v1467_v26  ;;  %v866_v57 = vmul.f32 %v1471_v37, %v1471_v37  ;;  %p1305_p13 = por %p1304_p12, %p1303_p11 }
 0x181   :  { %v755_v38 = vadd.f32 %v754_v32, %v1453_v53  ;;  %v889_v39 = vadd.f32 %v888_v33, %v858_v19  ;;  %v867_v62 = vmul.f32 %v1473_v41, %v1473_v41  ;;  %v868_v2 = vmul.f32 %v1477_v49, %v1477_v49 }
 0x182   :  { %v785_v40 = vadd.f32 %v784_v35, %v1455_v58  ;;  %v919_v42 = vadd.f32 %v918_v36, %v859_v23  ;;  %v871_v7 = vmul.f32 %v1485_v12, %v1485_v12  ;;  %v1356_v21 = vmov 1966171168   ;;  %p1306_p0 = pnand %p1305_p13, %p1299_p10 }
 0x183   :  { %v756_v43 = vadd.f32 %v755_v38, %v1459_v8  ;;  %v890_v45 = vadd.f32 %v889_v39, %v860_v29  ;;  %v801_v22 = vunpack.c.l.s4 %v1356_v21 }
 0x184   :  { %v786_v47 = vadd.f32 %v785_v40, %v1461_v13  ;;  %v920_v48 = vadd.f32 %v919_v42, %v861_v34 }
 0x185   :  { %v891_v53 = vadd.f32 %v890_v45, %v862_v44  ;;  %v757_v50 = vadd.f32 %v756_v43, %v1465_v20  ;;  %v802_v31 = vunpack.c.0.s8 %v801_v22  ;;  %v736_v45 = vld [vmem:[#allocation8] sm:$0x3] }
 0x186   :  { %v921_v58 = vadd.f32 %v920_v48, %v863_v46  ;;  %v787_v52 = vadd.f32 %v786_v47, %v1467_v26  ;;  %v870_v26 = vmul.f32 %v1483_v6, %v1483_v6 }
 0x187   :  { %v892_v8 = vadd.f32 %v891_v53, %v864_v51  ;;  %v758_v56 = vadd.f32 %v757_v50, %v1471_v37  ;;  %v869_v37 = vmul.f32 %v1479_v55, %v1479_v55 }
 0x188   :  { %v922_v13 = vadd.f32 %v921_v58, %v865_v54  ;;  %v788_v61 = vadd.f32 %v787_v52, %v1473_v41 }
 0x189   :  { %v893_v0 = vadd.f32 %v892_v8, %v866_v57  ;;  %v759_v20 = vadd.f32 %v758_v56, %v1477_v49 }
 0x18a   :  { %v923_v3 = vadd.f32 %v922_v13, %v867_v62  ;;  %v789_v4 = vadd.f32 %v788_v61, %v1479_v55 }
 0x18b   :  { %v894_v9 = vadd.f32 %v893_v0, %v868_v2  ;;  %v760_v41 = vadd.f32 %v759_v20, %v1483_v6 }
 0x18c   :  { %v924_v10 = vadd.f32 %v923_v3, %v869_v37  ;;  %v790_v14 = vadd.f32 %v789_v4, %v1485_v12  ;;  %v804_v12 = vshrl.u32 %v48_v59, 7  ;;  %v821_v59 = vld [vmem:[#allocation10] sm:$0x3] }
 0x18d   :  { %v761_v15 = vrot.slane %v760_v41, 4  ;;  %v895_v49 = vadd.f32 %v894_v9, %v870_v26 }
 0x18e   :  { %v791_v63 = vrot.slane %v790_v14, 4  ;;  %v925_v1 = vadd.f32 %v924_v10, %v871_v7  ;;  %v805_v39 = vsub.s32 %v802_v31, %v804_v12 }
 0x18f   :  { %v762_v5 = vadd.f32 %v761_v15, %v760_v41  ;;  %v896_v16 = vrot.slane %v895_v49, 4 }
 0x190   :  { %v792_v17 = vadd.f32 %v791_v63, %v790_v14  ;;  %v926_v18 = vrot.slane %v925_v1, 4 }
 0x191   :  { %v763_v55 = vrot.slane %v762_v5, 2  ;;  %v897_v24 = vadd.f32 %v896_v16, %v895_v49 }
 0x192   :  { %v793_v25 = vrot.slane %v792_v17, 2  ;;  %v927_v27 = vadd.f32 %v926_v18, %v925_v1 }
 0x193   :  { %v764_v28 = vadd.f32 %v763_v55, %v762_v5  ;;  %v898_v11 = vrot.slane %v897_v24, 2 }
 0x194   :  { %v794_v6 = vadd.f32 %v793_v25, %v792_v17  ;;  %v928_v30 = vrot.slane %v927_v27, 2 }
 0x195   :  { %v765_v19 = vrot.slane %v764_v28, 1  ;;  %v899_v32 = vadd.f32 %v898_v11, %v897_v24 }
 0x196   :  { %v795_v33 = vrot.slane %v794_v6, 1  ;;  %v929_v23 = vadd.f32 %v928_v30, %v927_v27 }
 0x197   :  { %v766_v35 = vadd.f32 %v765_v19, %v764_v28  ;;  %v900_v36 = vrot.slane %v899_v32, 1 }
 0x198   :  { %v796_v29 = vadd.f32 %v795_v33, %v794_v6  ;;  %v930_v38 = vrot.slane %v929_v23, 1 }
 0x199   :  { %v901_v34 = vadd.f32 %v900_v36, %v899_v32 }
 0x19a   :  { %v799_v40 = vcombine.low %v766_v35, %v796_v29  ;;  %v931_v42 = vadd.f32 %v930_v38, %v929_v23 }
 0x19c   :  { %v934_v43 = vcombine.low %v901_v34, %v931_v42  ;;  %v806_v44 = vrot.slane %v799_v40, %v805_v39 }
 0x19e   :  { %v813_v47 = vrot.slane %v806_v44, %v805_v39  ;;  %v941_v46 = vrot.slane %v934_v43, %v805_v39 }
 0x1a0   :  { %v815_v48 = vadd.f32 %v813_v47, %v736_v45  ;;  %v948_v53 = vrot.slane %v941_v46, %v805_v39 }
 0x1a2   :  { %820 = vst.msk [vmem:[#allocation8] sm:$0x3] %vm1415_vm0, %v815_v48  ;;  %v950_v50 = vadd.f32 %v948_v53, %v821_v59 }
 0x1a3   :  { %1309 = shalt.err (!%p1306_p0)
}
 0x1a4   :  { %s1310_s5 = scalar_lea.hbm %s1602_s3, 32 }
 0x1a5   :  { %p1311_p1 = scmp.ne.s32.totalorder %s1602_s3, %s1310_s5  ;;  %p1314_p2 = scmp.lt.u32.totalorder %s1310_s5, %s1602_s3 }
 0x1a7   :  { %p1316_p3 = pnand %p1314_p2, %p1311_p1 }
 0x1a9   :  { %1319 = shalt.err (!%p1316_p3)
}
 0x1aa   :  { %973 = dma.vmem_to_hbm [thread:$0]  %s971_s25, 32, %s1602_s3, [#allocation9]   ;;  %951 = vst.msk [vmem:[#allocation10] sm:$0x3] %vm1415_vm0, %v950_v50 }
 0x1ab   :  { %s1320_s12 = scalar_lea.vmem %s981_s27, 32  ;;  %p1325_p5 = scmp.lt.s32.totalorder %s981_s27, %s981_s27 }
 0x1ac   :  { %p1321_p4 = scmp.ne.s32.totalorder %s981_s27, %s1320_s12  ;;  %p1326_p6 = scmp.lt.s32.totalorder %s1320_s12, %s1320_s12 }
 0x1ae   :  { %p1327_p7 = por %p1326_p6, %p1325_p5 }
 0x1b0   :  { %p1328_p8 = pnand %p1327_p7, %p1321_p4 }
 0x1b2   :  { %1331 = shalt.err (!%p1328_p8)
}
 0x1b3   :  { %s1332_s1 = scalar_lea.hbm %s1603_s4, 32 }
 0x1b4   :  { %p1333_p9 = scmp.ne.s32.totalorder %s1603_s4, %s1332_s1  ;;  %p1336_p10 = scmp.lt.u32.totalorder %s1332_s1, %s1603_s4 }
 0x1b6   :  { %p1338_p11 = pnand %p1336_p10, %p1333_p9 }
 0x1b8   :  { %1341 = shalt.err (!%p1338_p11)
}
 0x1b9   :  { %983 = dma.vmem_to_hbm [thread:$0]  %s981_s27, 32, %s1603_s4, [#allocation9]  }
 0x1ba   :  { %1346 = dma.done.wait [#allocation4], 3200  }
 0x1bb   :  { %1347 = vsyncadd [#allocation4], 4294964096 }
 0x1bc   :  { %1348 = dma.done.wait [#allocation9], 64  }
 0x1bd   :  { %1349 = vsyncadd [#allocation9], 4294967232 }
 0x1be   :  { %993 = vsyncpa [#allocation3], 1 }
 0x1bf   :  { %994 = vsyncpa [#allocation6], 1 }
 0x1c0   :  { %995 = vsyncpa [#allocation4], 1 }
 0x1c1   :  { %996 = vsyncpa [#allocation9], 1 }

</bundles_post_ra>
